<compile_context>
chip_gen: v7x
topology: tpu7x:2x2x1
jax: 0.10.0
libtpu: 0.0.40
codegen_flags: <defaults>
</compile_context>

<pallas_src>
import functools

import jax
import jax.numpy as jnp
from jax.experimental import pallas as pl
from jax.experimental.pallas import tpu as pltpu

EMBED_DIM = 300      # matches the module's global embed_dim
VOCAB_SIZE = 50      # small synthetic vocab (module takes vocab_size as an arg)
MAX_TOK_BLOCK = 512  # cap for the per-step token tile (amortizes step overhead)


def _round_up(x, m):
    return (x + m - 1) // m * m


def _split_f32_to_3bf16(x):
    """Exact split of f32 `x` into three bf16 pieces with hi + mid + lo == x.

    f32 has a 24-bit significand = 3 x 8-bit bf16 significands; each residual
    subtraction below is exact, so the sum reconstructs x bit-for-bit (up to a
    ~1-ulp corner case near power-of-two boundaries)."""
    hi = x.astype(jnp.bfloat16)
    r1 = x - hi.astype(jnp.float32)
    mid = r1.astype(jnp.bfloat16)
    lo = (r1 - mid.astype(jnp.float32)).astype(jnp.bfloat16)
    return jnp.stack([hi, mid, lo], axis=0)


def prepare_embedding(table):
    """One-time (init-time) preparation of the embedding table.

    Pads to (pad_vocab=round128, pad_d=round128) for lane-dense tiles and
    splits into three exact bf16 planes for single-pass MXU matmuls.
    """
    vocab, d = table.shape
    pad_vocab = _round_up(vocab, 128)
    pad_d = _round_up(d, 128)
    table_p = (
        jnp.zeros((pad_vocab, pad_d), jnp.float32)
        .at[:vocab, :d]
        .set(table.astype(jnp.float32))
    )
    return {
        "table3": _split_f32_to_3bf16(table_p),   # (3, pad_vocab, pad_d) bf16
        "vocab": vocab,
        "embed_dim": d,
    }


def embed_kernel(idx_ref, table3_ref, out_ref, *, vocab):
    """Gather one block of embeddings via exact one-hot bf16 MXU matmuls.

    idx_ref    : VMEM (tok_block, 1) int32            -- token ids for this block
    table3_ref : VMEM (3, pad_vocab, pad_d) bf16      -- exact 3-way f32 split
    out_ref    : VMEM (tok_block, pad_d) f32
    """
    tok_block = idx_ref.shape[0]
    pad_vocab = table3_ref.shape[1]

    # In-kernel clamp of out-of-range ids (free: VPU has slack under the MXU).
    # Note: PyTorch nn.Embedding would raise on OOB ids; we clamp instead.
    ids = jnp.clip(idx_ref[...], 0, vocab - 1)                        # (T, 1)
    iota = jax.lax.broadcasted_iota(jnp.int32, (tok_block, pad_vocab), 1)
    onehot = (iota == ids).astype(jnp.bfloat16)                       # exact 0/1

    # Three single-pass bf16 matmuls, f32 accumulation: selects
    # hi[k] + mid[k] + lo[k] == table[k] exactly for each token.
    acc = jnp.dot(onehot, table3_ref[0], preferred_element_type=jnp.float32)
    acc += jnp.dot(onehot, table3_ref[1], preferred_element_type=jnp.float32)
    acc += jnp.dot(onehot, table3_ref[2], preferred_element_type=jnp.float32)
    out_ref[...] = acc.astype(out_ref.dtype)


def embedding_forward(w, params, *, max_tok_block=MAX_TOK_BLOCK):
    """w: (B, S) integer token ids; params: output of prepare_embedding.

    Returns (B, S, embed_dim) f32, identical to nn.Embedding(w)."""
    vocab = params["vocab"]
    d = params["embed_dim"]
    table3 = params["table3"]
    _, pad_vocab, pad_d = table3.shape

    B, S = w.shape
    num_tokens = B * S

    # Adaptive token tile: >=2 grid steps when possible (v7x has 2 TCs and the
    # grid axis is "parallel"), multiple of 8 sublanes, capped at max_tok_block.
    half = _round_up((num_tokens + 1) // 2, 8)
    tok_block = max(8, min(max_tok_block, half))
    padded_tokens = _round_up(num_tokens, tok_block)

    idx = w.reshape(-1).astype(jnp.int32)
    if padded_tokens != num_tokens:
        idx = jnp.pad(idx, (0, padded_tokens - num_tokens))
    idx = idx.reshape(padded_tokens, 1)

    grid = (padded_tokens // tok_block,)

    out_p = pl.pallas_call(
        functools.partial(embed_kernel, vocab=vocab),
        out_shape=jax.ShapeDtypeStruct((padded_tokens, pad_d), jnp.float32),
        grid_spec=pltpu.PrefetchScalarGridSpec(
            num_scalar_prefetch=0,
            grid=grid,
            in_specs=[
                # Per-block token ids (full last dim of size 1 -> legal block).
                pl.BlockSpec((tok_block, 1), lambda i: (i, 0)),
                # Whole padded/split table resident in VMEM; constant index_map
                # -> fetched once and reused across all grid steps.
                pl.BlockSpec((3, pad_vocab, pad_d), lambda i: (0, 0, 0)),
            ],
            out_specs=pl.BlockSpec((tok_block, pad_d), lambda i: (i, 0)),
        ),
        compiler_params=pltpu.CompilerParams(
            # Each grid step writes its own independent output tile.
            dimension_semantics=("parallel",),
        ),
    )(idx, table3)

    return out_p[:num_tokens, :d].reshape(B, S, d)


if __name__ == "__main__":
    key = jax.random.PRNGKey(0)
    k_tab, k_idx = jax.random.split(key)

    # nn.Embedding default init: N(0, 1)
    table = jax.random.normal(k_tab, (VOCAB_SIZE, EMBED_DIM), dtype=jnp.float32)

    B, S = 2, 8
    w = jax.random.randint(k_idx, (B, S), 0, VOCAB_SIZE, dtype=jnp.int32)

    params = prepare_embedding(table)   # init-time: pad + exact bf16 3-split
    out = embedding_forward(w, params)
    out = jax.block_until_ready(out)

    # Correctness vs. plain-JAX gather (== PyTorch nn.Embedding forward).
    # The exact 3-way bf16 split should reconstruct the f32 rows to ~1 ulp.
    ref = jnp.take(table, w.reshape(-1), axis=0).reshape(B, S, EMBED_DIM)
    assert out.shape == (B, S, EMBED_DIM)
    assert jnp.allclose(out, ref, rtol=1e-6, atol=1e-6), "mismatch vs reference gather"

    print("KERNEL_OK")
</pallas_src>

<mosaic_0001>
module attributes {stable_mosaic.version = 11 : i64} {
  func.func @embed_kernel(%arg0: i32, %arg1: memref<8x1xi32, #tpu.memory_space<vmem>>, %arg2: memref<3x128x384xbf16, #tpu.memory_space<vmem>>, %arg3: memref<8x384xf32, #tpu.memory_space<vmem>>) attributes {dimension_semantics = [#tpu.dimension_semantics<parallel>], iteration_bounds = array<i64: 2>, scalar_prefetch = 0 : i64, scratch_operands = 0 : i64, tpu.core_type = #tpu.core_type<tc>, window_params = [{transform_indices = @transform_0, window_bounds = array<i64: 8, 1>}, {pipeline_mode = #tpu.pipeline_mode<synchronous>, transform_indices = @transform_1, window_bounds = array<i64: 3, 128, 384>}, {transform_indices = @transform_2, window_bounds = array<i64: 8, 384>}]} {
    %c0 = arith.constant 0 : index
    %c0_0 = arith.constant 0 : index
    %0 = vector.load %arg1[%c0, %c0_0] : memref<8x1xi32, #tpu.memory_space<vmem>>, vector<8x1xi32>
    %c0_i32 = arith.constant 0 : i32
    %c49_i32 = arith.constant 49 : i32
    %1 = vector.broadcast %c0_i32 : i32 to vector<8x1xi32>
    %2 = arith.maxsi %1, %0 : vector<8x1xi32>
    %3 = vector.broadcast %c49_i32 : i32 to vector<8x1xi32>
    %4 = arith.minsi %3, %2 : vector<8x1xi32>
    %5 = tpu.iota {dimensions = array<i32: 1>} : vector<8x128xi32>
    %6 = vector.broadcast %4 : vector<8x1xi32> to vector<8x128xi32>
    %7 = arith.cmpi eq, %5, %6 : vector<8x128xi32>
    %8 = arith.extui %7 : vector<8x128xi1> to vector<8x128xi32>
    %9 = arith.sitofp %8 : vector<8x128xi32> to vector<8x128xf32>
    %10 = arith.truncf %9 : vector<8x128xf32> to vector<8x128xbf16>
    %c0_1 = arith.constant 0 : index
    %c0_2 = arith.constant 0 : index
    %c0_3 = arith.constant 0 : index
    %11 = vector.load %arg2[%c0_1, %c0_2, %c0_3] : memref<3x128x384xbf16, #tpu.memory_space<vmem>>, vector<1x128x384xbf16>
    %12 = vector.shape_cast %11 : vector<1x128x384xbf16> to vector<128x384xbf16>
    %cst = arith.constant dense<0.000000e+00> : vector<8x384xf32>
    %13 = tpu.matmul %10, %12, %cst {dimension_numbers = #tpu.dot_dimension_numbers<[1], [0], [0], [1], [0, 0, 1, 1], [], []>} : vector<8x128xbf16>, vector<128x384xbf16>, vector<8x384xf32> -> vector<8x384xf32>
    %c1 = arith.constant 1 : index
    %c0_4 = arith.constant 0 : index
    %c0_5 = arith.constant 0 : index
    %14 = vector.load %arg2[%c1, %c0_4, %c0_5] : memref<3x128x384xbf16, #tpu.memory_space<vmem>>, vector<1x128x384xbf16>
    %15 = vector.shape_cast %14 : vector<1x128x384xbf16> to vector<128x384xbf16>
    %cst_6 = arith.constant dense<0.000000e+00> : vector<8x384xf32>
    %16 = tpu.matmul %10, %15, %cst_6 {dimension_numbers = #tpu.dot_dimension_numbers<[1], [0], [0], [1], [0, 0, 1, 1], [], []>} : vector<8x128xbf16>, vector<128x384xbf16>, vector<8x384xf32> -> vector<8x384xf32>
    %17 = arith.addf %13, %16 : vector<8x384xf32>
    %c2 = arith.constant 2 : index
    %c0_7 = arith.constant 0 : index
    %c0_8 = arith.constant 0 : index
    %18 = vector.load %arg2[%c2, %c0_7, %c0_8] : memref<3x128x384xbf16, #tpu.memory_space<vmem>>, vector<1x128x384xbf16>
    %19 = vector.shape_cast %18 : vector<1x128x384xbf16> to vector<128x384xbf16>
    %cst_9 = arith.constant dense<0.000000e+00> : vector<8x384xf32>
    %20 = tpu.matmul %10, %19, %cst_9 {dimension_numbers = #tpu.dot_dimension_numbers<[1], [0], [0], [1], [0, 0, 1, 1], [], []>} : vector<8x128xbf16>, vector<128x384xbf16>, vector<8x384xf32> -> vector<8x384xf32>
    %21 = arith.addf %17, %20 : vector<8x384xf32>
    %c0_10 = arith.constant 0 : index
    %c0_11 = arith.constant 0 : index
    %22 = vector.load %arg3[%c0_10, %c0_11] : memref<8x384xf32, #tpu.memory_space<vmem>>, vector<8x384xf32>
    tpu.vector_store %arg3[%c0_10, %c0_11], %21 {strides = array<i32>} : memref<8x384xf32, #tpu.memory_space<vmem>>, vector<8x384xf32>,
    return
  }
  func.func @transform_0(%arg0: i32) -> (i32, i32) {
    %c0_i32 = arith.constant 0 : i32
    %c0_i32_0 = arith.constant 0 : i32
    return %arg0, %c0_i32 : i32, i32
  }
  func.func @transform_1(%arg0: i32) -> (i32, i32, i32) {
    %c0_i32 = arith.constant 0 : i32
    %c0_i32_0 = arith.constant 0 : i32
    %c0_i32_1 = arith.constant 0 : i32
    %c0_i32_2 = arith.constant 0 : i32
    return %c0_i32, %c0_i32_0, %c0_i32_1 : i32, i32, i32
  }
  func.func @transform_2(%arg0: i32) -> (i32, i32) {
    %c0_i32 = arith.constant 0 : i32
    %c0_i32_0 = arith.constant 0 : i32
    return %arg0, %c0_i32 : i32, i32
  }
}

</mosaic_0001>

<bundles_post_ra>
// kernel: tpu_custom_call.1
= control target key start
LH: loop header
LB: loop body
LE: loop exit
PB: predicated region body
PF: predicated region fallthrough
CT: control target
= control target key end

     0   :  { %7 = vsyncpa [#allocation3], 0  ;;  %s1649_s0 = inlined_call_operand.vmem [shape: s32[16,1], index: 0, kind: input, shape index: {}]   ;;  %s1650_s1 = inlined_call_operand.hbm [shape: bf16[3,128,384], index: 1, kind: input, shape index: {}]   ;;  %s1651_s2 = inlined_call_operand.hbm [shape: f32[16,384], index: 2, kind: output, shape index: {}]  }
   0x1   :  { %8 = vsyncpa [#allocation4], 0 }
   0x2   :  { %10 = vsyncpa [#allocation4 + $0x1], 0  ;;  %s1458_s9 = smov 0   ;;  %s1460_s10 = smov 0  }
   0x3   :  { %s1462_s11 = smov 0   ;;  %s1464_s12 = smov 0  }
   0x4 LB: > { %s1479_s13 = sadd.s32 4294967295, %s1433_s12   ;;  %s986_s14 = sadd.s32 4294967294, %s1433_s12   ;;  %s1433_s12 = sphi %s1464_s12, %s1669_s12   ;;  %s1429_s11 = sphi %s1462_s11, %s1668_s11   ;;  %s1425_s10 = sphi %s1460_s10, %s1667_s10   ;;  %s1421_s9 = sphi %s1458_s9, %s1666_s9  }
   0x5   : > { %s1483_s15 = sadd.s32 1, %s1433_s12   ;;  %s70_s16 = sadd.s32 1, %s1429_s11 }
   0x6   : > { %s67_s17 = ssub.s32 %s1433_s12, %s1483_s15  ;;  %p80_p0 = scmp.ne.s32.totalorder %s1429_s11, %s1425_s10 }
   0x7   : > { %p68_p1 = scmp.eq.s32.totalorder %s67_s17, 0  ;;  %p81_p2 = scmp.eq.s32.totalorder %s1479_s13, 1 }
   0x8   : > { %p86_p3 = scmp.ne.s32.totalorder %s1425_s10, %s1421_s9  ;;  %p87_p4 = scmp.eq.s32.totalorder %s986_s14, 1 }
   0x9   : > { %s1494_s18 = scalar_select %p68_p1, %s1429_s11, %s70_s16  }
   0xa   : > { %p1496_p5 = por %p81_p2, %p80_p0  ;;  %p1500_p6 = por %p87_p4, %p86_p3 }
   0xb   : > { %p987_p7 = scmp.ge.s32.totalorder %s1433_s12, 1  ;;  %p94_p8 = scmp.lt.s32.totalorder %s1433_s12, 3 }
   0xc   : > { %s1655_s19 = scalar_select %p1496_p5, 1, 0 }
   0xd   : > { %s1656_s20 = scalar_select %p1500_p6, 1, 0 }
   0xe   : > { %p1652_p9 = scmp.eq.s32.totalorder %s1479_s13, 0  ;;  %p1507_p10 = pnand %p987_p7, %p94_p8 }
   0xf   : > { %s1435_s22 = smov [#allocation2]   ;;  %s1339_s27 = scalar_lea.hbm %s1650_s1, 9216 }
  0x10   : > { %s1657_s21 = scalar_select %p1507_p10, 1, 0 }
  0x11   : > { %s106_s23 = sshll.u32 %s1435_s22, 4  ;;  %p1192_p11 = pneg %p1507_p10  ;;  %s107_s23 = int_to_ptr.vmem [resolvable:$true] %s106_s23 }
  0x12   : > { %p1340_p13 = scmp.ne.s32.totalorder %s1650_s1, %s1339_s27  ;;  %p1346_p3 = scmp.lt.u32.totalorder %s1339_s27, %s1650_s1 }
  0x13   : > { %p1515_p12 = pnand %p1652_p9, %p1192_p11 }
  0x15   : > { %p1341_p0 = pneg %p1515_p12 }
  0x17   : > { %p1342_p1 = pnand %p1341_p0, %p1340_p13 }
  0x19   : > { %p1343_p2 = pneg %p1342_p1 }
  0x1b   : > { %p1348_p4 = pnand %p1346_p3, %p1343_p2 }
  0x1d   : > { %1351 = shalt.err (!%p1348_p4)
}
  0x1e   : > { %s1352_s4 = scalar_lea.vmem %s107_s23, 9216  ;;  %p1360_p9 = scmp.lt.s32.totalorder %s107_s23, %s107_s23 }
  0x1f   : > { %p1353_p7 = scmp.ne.s32.totalorder %s107_s23, %s1352_s4  ;;  %p1361_p6 = scmp.lt.s32.totalorder %s1352_s4, %s1352_s4 }
  0x21   : > { %p1355_p8 = pnand %p1353_p7, %p1341_p0  ;;  %p1362_p5 = por %p1361_p6, %p1360_p9 }
  0x23   : > { %p1356_p11 = pneg %p1355_p8 }
  0x25   : > { %p1363_p10 = pnand %p1362_p5, %p1356_p11 }
  0x27   : > { %1366 = shalt.err (!%p1363_p10)
}
  0x28   : > { %s1436_s5 = smov 192   ;;  %s1437_s6 = smov 12  }
  0x29   : > { %1195 = dma.hbm_to_vmem [thread:$0]  (!%p1515_p12), %s1650_s1, 9216, %s107_s23, [#allocation3], %s1436_s5, %s1436_s5, %s1437_s6  }
  0x2a   : > { %p1659_p13 = scmp.ne.s32.totalorder %s1657_s21, 0 }
  0x2b   : > { %p1660_p1 = scmp.eq.s32.totalorder (!%p1659_p13), %s1479_s13, 0 }
  0x2c   : > { %129 = sbr.rel (%p1659_p13) target bundleno = 485 (0x1e5), region = 28 }
  0x33   : > { %1412 = dma.done.wait (%p1660_p1), [#allocation3], 9216   ;;  %p1661_p0 = pmov %p1660_p1 }
  0x34   : > { %p150_p5 = scmp.lt.s32.totalorder %s1479_s13, 1  ;;  %v1438_v0 = vmov 0   ;;  %v1439_v1 = vmov 0.0   ;;  %v1243_v3 = vld [vmem:[#allocation2 + $0xc4] ss:$12 sps:$4 sm:$0xff]   ;;  %vm1440_vm2 = vmmov 0   ;;  %v160_v30 = vlaneseq }
  0x35   : > { %1414 = vsyncadd (%p1661_p0), [#allocation3], 4294958080  ;;  %1242 = vset.pattern.permute.xlu0 %v1438_v0  ;;  %1108 = vmatprep.subr.bf16.mxu1 %v1439_v1  ;;  %v1245_v4 = vld [vmem:[#allocation2 + $0xc0] ss:$12 sps:$4 sm:$0xff]   ;;  %v1246_v6 = vld [vmem:[#allocation2 + $0xc8] ss:$12 sps:$4 sm:$0xff]  }
  0x36   : > { %s151_s14 = scalar_select %p150_p5, %s1479_s13, 1  ;;  %394 = vmatprep.mubr.bf16.mxu0 %v1438_v0  ;;  %362 = vmatprep.subr.bf16.mxu0 %v1243_v3  ;;  %v1247_v7 = vld [vmem:[#allocation2 + $0xdc] ss:$12 sps:$4 sm:$0xff]   ;;  %v1249_v9 = vld [vmem:[#allocation2 + $0xd8] ss:$12 sps:$4 sm:$0xff]   ;;  %v161_v31 = vand.u32 127, %v160_v30 }
  0x37   : > { %363 = vmatpush1.bf16.msra.mxu0 %v1245_v4  ;;  %1109 = vmatpush3.bf16.msra.mxu1 %v1246_v6  ;;  %v1250_v10 = vld [vmem:[#allocation2 + $0xe0] ss:$12 sps:$4 sm:$0xff]   ;;  %v1253_v12 = vld [vmem:[#allocation2 + $0xf0] ss:$12 sps:$4 sm:$0xff]   ;;  %v1254_v13 = vld [vmem:[#allocation2 + $0xf8] ss:$12 sps:$4 sm:$0xff]  }
  0x38   : > { %s992_s16 = sshll.u32 %s151_s14, 3  ;;  %v1251_v11 = vld [vmem:[#allocation2 + $0xf4] ss:$12 sps:$4 sm:$0xff]   ;;  %364 = vmatprep.subr.bf16.mxu0 %v1247_v7  ;;  %1110 = vmatprep.subr.bf16.mxu1 %v1439_v1  ;;  %v1255_v14 = vld [vmem:[#allocation2 + $0x10c] ss:$12 sps:$4 sm:$0xff]   ;;  %s147_s23 = sand.u32 1, %s1425_s10  }
  0x39   : > { %s153_s22 = scalar_lea.vmem %s1649_s0, %s992_s16  ;;  %1124 = vmatprep.mubr.msk.bf16.mxu1 %vm1440_vm2, %v1439_v1  ;;  %v1257_v15 = vld [vmem:[#allocation2 + $0x108] ss:$12 sps:$4 sm:$0xff]   ;;  %v1258_v16 = vld [vmem:[#allocation2 + $0x110] ss:$12 sps:$4 sm:$0xff]   ;;  %v1261_v18 = vld [vmem:[#allocation2 + $0x120] ss:$12 sps:$4 sm:$0xff]  }
  0x3a   : > { %v155_v2 = vld [vmem:[%s153_s22] sm:$0xff]  ;;  %v1262_v19 = vld [vmem:[#allocation2 + $0x128] ss:$12 sps:$4 sm:$0xff]   ;;  %v1269_v24 = vld [vmem:[#allocation2 + $0x150] ss:$12 sps:$4 sm:$0xff]   ;;  %s1184_s24 = smul.u32 24, %s147_s23 }
  0x3b   : > { %vm156_vm0 = vcmp.gt.s32.totalorder %v155_v2, 0  ;;  %365 = vmatpush1.bf16.msra.mxu0 %v1249_v9  ;;  %1111 = vmatpush3.bf16.msra.mxu1 %v1250_v10  ;;  %v1259_v17 = vld [vmem:[#allocation2 + $0x124] ss:$12 sps:$4 sm:$0xff]   ;;  %v1263_v20 = vld [vmem:[#allocation2 + $0x13c] ss:$12 sps:$4 sm:$0xff]   ;;  %s1185_s25 = smul.u32 384, %s1479_s13 }
  0x3c   : > { %v157_v5 = vsel %vm156_vm0, %v155_v2, 0  ;;  %366 = vmatprep.subr.bf16.mxu0 %v1251_v11  ;;  %1112 = vmatprep.subr.bf16.mxu1 %v1439_v1  ;;  %v1265_v21 = vld [vmem:[#allocation2 + $0x138] ss:$12 sps:$4 sm:$0xff]   ;;  %v1266_v22 = vld [vmem:[#allocation2 + $0x140] ss:$12 sps:$4 sm:$0xff]   ;;  %s149_s26 = scalar_lea.vmem [#allocation5], %s1184_s24 }
  0x3d   : > { %vm158_vm1 = vcmp.lt.s32.totalorder %v157_v5, 49  ;;  %v1267_v23 = vld [vmem:[#allocation2 + $0x154] ss:$12 sps:$4 sm:$0xff]   ;;  %v1270_v25 = vld [vmem:[#allocation2 + $0x158] ss:$12 sps:$4 sm:$0xff]   ;;  %s915_s27 = sshll.u32 %s149_s26, 4  ;;  %s1609_s30 = scalar_lea.hbm %s1651_s2, %s1185_s25  ;;  %s1604_s27 = int_to_ptr.vmem [resolvable:$true] %s915_s27 }
  0x3e   : > { %v159_v8 = vsel %vm158_vm1, %v157_v5, 49  ;;  %v1271_v26 = vld [vmem:[#allocation2 + $0x16c] ss:$12 sps:$4 sm:$0xff]   ;;  %v1273_v27 = vld [vmem:[#allocation2 + $0x168] ss:$12 sps:$4 sm:$0xff]   ;;  %s901_s13 = scalar_lea.sflag [#allocation4], %s147_s23 }
  0x3f   : > { %163 = vperm.xlu0 %1242, %v159_v8   ;;  %367 = vmatpush1.bf16.msra.mxu0 %v1253_v12  ;;  %v1274_v28 = vld [vmem:[#allocation2 + $0x170] ss:$12 sps:$4 sm:$0xff]   ;;  %v1275_v33 = vld [vmem:[#allocation2] ss:$12 sps:$4 sm:$0xff]   ;;  %v1278_v34 = vld [vmem:[#allocation2 + $0x8] ss:$12 sps:$4 sm:$0xff]  }
  0x40   : > { %1113 = vmatpush3.bf16.msra.mxu1 %v1254_v13  ;;  %368 = vmatprep.subr.bf16.mxu0 %v1255_v14  ;;  %v1277_v29 = vld [vmem:[#allocation2 + $0x4] ss:$12 sps:$4 sm:$0xff]   ;;  %v1281_v35 = vld [vmem:[#allocation2 + $0x1c] ss:$12 sps:$4 sm:$0xff]   ;;  %v1441_v37 = vmov 1.0|1.0  }
  0x41   : > { %1114 = vmatprep.subr.bf16.mxu1 %v1439_v1  ;;  %v1279_v38 = vld [vmem:[#allocation2 + $0x18] ss:$12 sps:$4 sm:$0xff]   ;;  %v1282_v39 = vld [vmem:[#allocation2 + $0x20] ss:$12 sps:$4 sm:$0xff]   ;;  %v1283_v41 = vld [vmem:[#allocation2 + $0x30] ss:$12 sps:$4 sm:$0xff]  }
  0x42   : > { %v1285_v40 = vld [vmem:[#allocation2 + $0x34] ss:$12 sps:$4 sm:$0xff]   ;;  %v1286_v42 = vld [vmem:[#allocation2 + $0x38] ss:$12 sps:$4 sm:$0xff]   ;;  %v1290_v45 = vld [vmem:[#allocation2 + $0x50] ss:$12 sps:$4 sm:$0xff]  }
  0x43   : > { %369 = vmatpush1.bf16.msra.mxu0 %v1257_v15  ;;  %v1289_v43 = vld [vmem:[#allocation2 + $0x4c] ss:$12 sps:$4 sm:$0xff]   ;;  %v1287_v44 = vld [vmem:[#allocation2 + $0x48] ss:$12 sps:$4 sm:$0xff]   ;;  %v1293_v46 = vld [vmem:[#allocation2 + $0x64] ss:$12 sps:$4 sm:$0xff]  }
  0x44   : > { %1115 = vmatpush3.bf16.msra.mxu1 %v1258_v16  ;;  %370 = vmatprep.subr.bf16.mxu0 %v1259_v17  ;;  %v1291_v47 = vld [vmem:[#allocation2 + $0x60] ss:$12 sps:$4 sm:$0xff]   ;;  %v1294_v48 = vld [vmem:[#allocation2 + $0x68] ss:$12 sps:$4 sm:$0xff]   ;;  %v1295_v50 = vld [vmem:[#allocation2 + $0x78] ss:$12 sps:$4 sm:$0xff]  }
  0x45   : > { %1116 = vmatprep.subr.bf16.mxu1 %v1439_v1  ;;  %v1297_v49 = vld [vmem:[#allocation2 + $0x7c] ss:$12 sps:$4 sm:$0xff]   ;;  %v1298_v51 = vld [vmem:[#allocation2 + $0x80] ss:$12 sps:$4 sm:$0xff]   ;;  %v1302_v54 = vld [vmem:[#allocation2 + $0x98] ss:$12 sps:$4 sm:$0xff]  }
  0x46   : > { %v1301_v52 = vld [vmem:[#allocation2 + $0x94] ss:$12 sps:$4 sm:$0xff]   ;;  %v1299_v53 = vld [vmem:[#allocation2 + $0x90] ss:$12 sps:$4 sm:$0xff]   ;;  %v1305_v55 = vld [vmem:[#allocation2 + $0xac] ss:$12 sps:$4 sm:$0xff]  }
  0x47   : > { %371 = vmatpush1.bf16.msra.mxu0 %v1261_v18  ;;  %v1303_v56 = vld [vmem:[#allocation2 + $0xa8] ss:$12 sps:$4 sm:$0xff]   ;;  %v1306_v57 = vld [vmem:[#allocation2 + $0xb0] ss:$12 sps:$4 sm:$0xff]   ;;  %v1307_v59 = vld [vmem:[#allocation2 + $0x180] ss:$12 sps:$4 sm:$0xff]  }
  0x48   : > { %1117 = vmatpush3.bf16.msra.mxu1 %v1262_v19  ;;  %372 = vmatprep.subr.bf16.mxu0 %v1263_v20  ;;  %v1309_v58 = vld [vmem:[#allocation2 + $0x184] ss:$12 sps:$4 sm:$0xff]   ;;  %v1310_v60 = vld [vmem:[#allocation2 + $0x188] ss:$12 sps:$4 sm:$0xff]   ;;  %v1314_v63 = vld [vmem:[#allocation2 + $0x1a0] ss:$12 sps:$4 sm:$0xff]  }
  0x49   : > { %1118 = vmatprep.subr.bf16.mxu1 %v1439_v1  ;;  %v1313_v61 = vld [vmem:[#allocation2 + $0x19c] ss:$12 sps:$4 sm:$0xff]   ;;  %v1311_v62 = vld [vmem:[#allocation2 + $0x198] ss:$12 sps:$4 sm:$0xff]   ;;  %v1317_v2 = vld [vmem:[#allocation2 + $0x1b4] ss:$12 sps:$4 sm:$0xff]  }
  0x4a   : > { %v1315_v3 = vld [vmem:[#allocation2 + $0x1b0] ss:$12 sps:$4 sm:$0xff]   ;;  %v1318_v4 = vld [vmem:[#allocation2 + $0x1b8] ss:$12 sps:$4 sm:$0xff]   ;;  %v1319_v6 = vld [vmem:[#allocation2 + $0x1c8] ss:$12 sps:$4 sm:$0xff]  }
  0x4b   : > { %373 = vmatpush1.bf16.msra.mxu0 %v1265_v21  ;;  %v1321_v5 = vld [vmem:[#allocation2 + $0x1cc] ss:$12 sps:$4 sm:$0xff]   ;;  %v1322_v7 = vld [vmem:[#allocation2 + $0x1d0] ss:$12 sps:$4 sm:$0xff]   ;;  %v1326_v9 = vld [vmem:[#allocation2 + $0x1e8] ss:$12 sps:$4 sm:$0xff]  }
  0x4c   : > { %1119 = vmatpush3.bf16.msra.mxu1 %v1266_v22  ;;  %374 = vmatprep.subr.bf16.mxu0 %v1267_v23  ;;  %v1325_v8 = vld [vmem:[#allocation2 + $0x1e4] ss:$12 sps:$4 sm:$0xff]   ;;  %v1329_v10 = vld [vmem:[#allocation2 + $0x1fc] ss:$12 sps:$4 sm:$0xff]   ;;  %v1330_v12 = vld [vmem:[#allocation2 + $0x200] ss:$12 sps:$4 sm:$0xff]  }
  0x4d   : > { %1120 = vmatprep.subr.bf16.mxu1 %v1439_v1  ;;  %v1327_v11 = vld [vmem:[#allocation2 + $0x1f8] ss:$12 sps:$4 sm:$0xff]   ;;  %v1333_v13 = vld [vmem:[#allocation2 + $0x214] ss:$12 sps:$4 sm:$0xff]   ;;  %v1331_v14 = vld [vmem:[#allocation2 + $0x210] ss:$12 sps:$4 sm:$0xff]  }
  0x4e   : > { %v1334_v15 = vld [vmem:[#allocation2 + $0x218] ss:$12 sps:$4 sm:$0xff]   ;;  %v1335_v17 = vld [vmem:[#allocation2 + $0x228] ss:$12 sps:$4 sm:$0xff]   ;;  %v1338_v18 = vld [vmem:[#allocation2 + $0x230] ss:$12 sps:$4 sm:$0xff]  }
  0x4f   : > { %375 = vmatpush1.bf16.msra.mxu0 %v1269_v24  ;;  %v1337_v16 = vld [vmem:[#allocation2 + $0x22c] ss:$12 sps:$4 sm:$0xff]   ;;  %s1367_s3 = scalar_lea.vmem %s1604_s27, 384  ;;  %p1664_p9 = scmp.ne.s32.totalorder %s1655_s19, 0 }
  0x50   : > { %1121 = vmatpush3.bf16.msra.mxu1 %v1270_v25  ;;  %376 = vmatprep.subr.bf16.mxu0 %v1271_v26  ;;  %p1368_p6 = scmp.ne.s32.totalorder %s1604_s27, %s1367_s3  ;;  %s1442_s4 = smov [#allocation5]  }
  0x51   : > { %1122 = vmatprep.subr.bf16.mxu1 %v1439_v1  ;;  %s1371_s5 = sshll.u32 %s1442_s4, 4  ;;  %s1372_s5 = int_to_ptr.vmem [resolvable:$false] %s1371_s5 }
  0x52   : > { %p1369_p10 = pnand %p1368_p6, %p1664_p9  ;;  %s1373_s6 = scalar_lea.vmem %s1372_s5, 768 }
  0x53   : > { %377 = vmatpush1.bf16.msra.mxu0 %v1273_v27  ;;  %p1374_p2 = scmp.lt.s32.totalorder %s1604_s27, %s1372_s5  ;;  %p1375_p3 = scmp.lt.s32.totalorder %s1373_s6, %s1367_s3 }
  0x54   : > { %1123 = vmatpush3.bf16.msra.mxu1 %v1274_v28  ;;  %571 = vmatprep.subr.bf16.mxu0 %v1277_v29  ;;  %p1370_p12 = pneg %p1369_p10 }
  0x55   : > { %1128 = vmatprep.subr.bf16.mxu1 %v1439_v1  ;;  %p1376_p4 = por %p1375_p3, %p1374_p2 }
  0x57   : > { %p1377_p7 = pnand %p1376_p4, %p1370_p12 }
  0xbe   : > { %v164_v32 = vpop.permute.xlu0 %163 }
  0xbf   : > { %vm165_vm3 = vcmp.eq.s32.totalorder %v161_v31, %v164_v32 }
  0xc0   : > { %vm1559_vm4 = vmpackc.low %vm165_vm3, %vm165_vm3 }
  0xc1   : > { %1019 = vmatmul.mubr.msk.bf16.vlgmr.msra.gmra.mrb[0].mxu0 %vm1559_vm4, %v1441_v37  ;;  %1125 = vmatmul.mubr.msk.bf16.vlgmr.msra.gmra.mrb[0].mxu1 %vm1559_vm4, %v1441_v37 }
  0xc2   : > { %572 = vmatpush1.bf16.msra.mxu0 %v1275_v33  ;;  %1129 = vmatpush3.bf16.msra.mxu1 %v1278_v34 }
  0xc3   : > { %573 = vmatprep.subr.bf16.mxu0 %v1281_v35  ;;  %1130 = vmatprep.subr.bf16.mxu1 %v1439_v1 }
  0xc4   : > { %603 = vmatprep.mubr.bf16.mxu0 %v1438_v0  ;;  %1144 = vmatprep.mubr.msk.bf16.mxu1 %vm1440_vm2, %v1439_v1 }
  0xc6   : > { %574 = vmatpush1.bf16.msra.mxu0 %v1279_v38  ;;  %1131 = vmatpush3.bf16.msra.mxu1 %v1282_v39 }
  0xc7   : > { %575 = vmatprep.subr.bf16.mxu0 %v1285_v40  ;;  %1132 = vmatprep.subr.bf16.mxu1 %v1439_v1 }
  0xca   : > { %576 = vmatpush1.bf16.msra.mxu0 %v1283_v41  ;;  %1133 = vmatpush3.bf16.msra.mxu1 %v1286_v42 }
  0xcb   : > { %577 = vmatprep.subr.bf16.mxu0 %v1289_v43  ;;  %1134 = vmatprep.subr.bf16.mxu1 %v1439_v1 }
  0xce   : > { %578 = vmatpush1.bf16.msra.mxu0 %v1287_v44  ;;  %1135 = vmatpush3.bf16.msra.mxu1 %v1290_v45 }
  0xcf   : > { %579 = vmatprep.subr.bf16.mxu0 %v1293_v46  ;;  %1136 = vmatprep.subr.bf16.mxu1 %v1439_v1 }
  0xd2   : > { %580 = vmatpush1.bf16.msra.mxu0 %v1291_v47  ;;  %1137 = vmatpush3.bf16.msra.mxu1 %v1294_v48 }
  0xd3   : > { %581 = vmatprep.subr.bf16.mxu0 %v1297_v49  ;;  %1138 = vmatprep.subr.bf16.mxu1 %v1439_v1 }
  0xd6   : > { %582 = vmatpush1.bf16.msra.mxu0 %v1295_v50  ;;  %1139 = vmatpush3.bf16.msra.mxu1 %v1298_v51 }
  0xd7   : > { %583 = vmatprep.subr.bf16.mxu0 %v1301_v52  ;;  %1140 = vmatprep.subr.bf16.mxu1 %v1439_v1 }
  0xda   : > { %584 = vmatpush1.bf16.msra.mxu0 %v1299_v53  ;;  %1141 = vmatpush3.bf16.msra.mxu1 %v1302_v54 }
  0xdb   : > { %585 = vmatprep.subr.bf16.mxu0 %v1305_v55  ;;  %1142 = vmatprep.subr.bf16.mxu1 %v1439_v1 }
  0xde   : > { %586 = vmatpush1.bf16.msra.mxu0 %v1303_v56  ;;  %1143 = vmatpush3.bf16.msra.mxu1 %v1306_v57 }
  0xdf   : > { %813 = vmatprep.subr.bf16.mxu0 %v1309_v58  ;;  %1148 = vmatprep.subr.bf16.mxu1 %v1439_v1 }
  0xe1   : > { %1047 = vmatmul.mubr.msk.bf16.vlgmr.msra.gmra.mrb[0].mxu0 %vm1559_vm4, %v1441_v37  ;;  %1145 = vmatmul.mubr.msk.bf16.vlgmr.msra.gmra.mrb[0].mxu1 %vm1559_vm4, %v1441_v37 }
  0xe2   : > { %814 = vmatpush1.bf16.msra.mxu0 %v1307_v59  ;;  %1149 = vmatpush3.bf16.msra.mxu1 %v1310_v60 }
  0xe3   : > { %815 = vmatprep.subr.bf16.mxu0 %v1313_v61  ;;  %1150 = vmatprep.subr.bf16.mxu1 %v1439_v1 }
  0xe4   : > { %845 = vmatprep.mubr.bf16.mxu0 %v1438_v0  ;;  %1164 = vmatprep.mubr.msk.bf16.mxu1 %vm1440_vm2, %v1439_v1  ;;  %v1323_v0 = vld [vmem:[#allocation2 + $0x1e0] ss:$12 sps:$4 sm:$0xff]  }
  0xe6   : > { %816 = vmatpush1.bf16.msra.mxu0 %v1311_v62  ;;  %1151 = vmatpush3.bf16.msra.mxu1 %v1314_v63 }
  0xe7   : > { %817 = vmatprep.subr.bf16.mxu0 %v1317_v2  ;;  %1152 = vmatprep.subr.bf16.mxu1 %v1439_v1 }
  0xea   : > { %818 = vmatpush1.bf16.msra.mxu0 %v1315_v3  ;;  %1153 = vmatpush3.bf16.msra.mxu1 %v1318_v4 }
  0xeb   : > { %819 = vmatprep.subr.bf16.mxu0 %v1321_v5  ;;  %1154 = vmatprep.subr.bf16.mxu1 %v1439_v1 }
  0xee   : > { %820 = vmatpush1.bf16.msra.mxu0 %v1319_v6  ;;  %1155 = vmatpush3.bf16.msra.mxu1 %v1322_v7 }
  0xef   : > { %821 = vmatprep.subr.bf16.mxu0 %v1325_v8  ;;  %1156 = vmatprep.subr.bf16.mxu1 %v1439_v1 }
  0xf2   : > { %822 = vmatpush1.bf16.msra.mxu0 %v1323_v0  ;;  %1157 = vmatpush3.bf16.msra.mxu1 %v1326_v9 }
  0xf3   : > { %823 = vmatprep.subr.bf16.mxu0 %v1329_v10  ;;  %1158 = vmatprep.subr.bf16.mxu1 %v1439_v1 }
  0xf6   : > { %824 = vmatpush1.bf16.msra.mxu0 %v1327_v11  ;;  %1159 = vmatpush3.bf16.msra.mxu1 %v1330_v12 }
  0xf7   : > { %825 = vmatprep.subr.bf16.mxu0 %v1333_v13  ;;  %1160 = vmatprep.subr.bf16.mxu1 %v1439_v1 }
  0xfa   : > { %826 = vmatpush1.bf16.msra.mxu0 %v1331_v14  ;;  %1161 = vmatpush3.bf16.msra.mxu1 %v1334_v15 }
  0xfb   : > { %827 = vmatprep.subr.bf16.mxu0 %v1337_v16  ;;  %1162 = vmatprep.subr.bf16.mxu1 %v1439_v1 }
  0xfe   : > { %828 = vmatpush1.bf16.msra.mxu0 %v1335_v17  ;;  %1163 = vmatpush3.bf16.msra.mxu1 %v1338_v18 }
 0x101   : > { %1075 = vmatmul.mubr.msk.bf16.vlgmr.msra.gmra.mrb[0].mxu0 %vm1559_vm4, %v1441_v37  ;;  %1165 = vmatmul.mubr.msk.bf16.vlgmr.msra.gmra.mrb[0].mxu1 %vm1559_vm4, %v1441_v37 }
 0x1d4   : > { %v847_v19 = vpop.f32.mrb[0].mxu0  ;;  %v888_v1 = vpop.f32.mrb[0].mxu1 }
 0x1d5   : > { %897 = vst [vmem:[%s149_s26] sm:$0xff] %v847_v19  ;;  %899 = vst [vmem:[%s149_s26 + $0x10] sm:$0xff] %v888_v1  ;;  %v849_v20 = vpop.f32.mrb[1].mxu0  ;;  %v1166_v21 = vpop.f32.mrb[1].mxu1 }
 0x1d6   : > { %898 = vst [vmem:[%s149_s26 + $0x8] sm:$0xff] %v849_v20  ;;  %v851_v22 = vpop.f32.mrb[2].mxu0  ;;  %v891_v23 = vpop.f32.mrb[2].mxu1 }
 0x1d7   : > { %v852_v24 = vpop.f32.mrb[3].mxu0  ;;  %v1167_v25 = vpop.f32.mrb[3].mxu1 }
 0x1d8   : > { %1380 = shalt.err (!%p1377_p7)
}
 0x1d9   : > { %s1381_s7 = scalar_lea.hbm %s1609_s30, 384  ;;  %s1385_s16 = scalar_lea.hbm %s1651_s2, 768 }
 0x1da   : > { %p1382_p8 = scmp.ne.s32.totalorder %s1609_s30, %s1381_s7  ;;  %p1386_p1 = scmp.lt.u32.totalorder %s1609_s30, %s1651_s2 }
 0x1db   : > { %p1387_p0 = scmp.lt.u32.totalorder %s1385_s16, %s1381_s7  ;;  %p1389_p6 = scmp.lt.u32.totalorder %s1381_s7, %s1609_s30 }
 0x1dc   : > { %p1383_p11 = pnand %p1382_p8, %p1664_p9 }
 0x1dd   : > { %p1388_p5 = por %p1387_p0, %p1386_p1 }
 0x1de   : > { %p1384_p13 = pneg %p1383_p11 }
 0x1df   : > { %p1390_p10 = por %p1389_p6, %p1388_p5 }
 0x1e1   : > { %p1391_p12 = pnand %p1390_p10, %p1384_p13 }
 0x1e3   : > { %1394 = shalt.err (!%p1391_p12)
}
 0x1e4   : > { %1190 = dma.vmem_to_hbm [thread:$0]  (%p1664_p9), %s1604_s27, 384, %s1609_s30, %s901_s13  }
 0x1e5 PF: > { %p1202_p2 = scmp.ge.s32.totalorder %s1433_s12, 2  ;;  %s927_s22 = sand.u32 1, %s1421_s9  }
 0x1e6   : > { %p1665_p3 = scmp.ne.s32.totalorder %s1656_s20, 0  ;;  %s928_s23 = scalar_lea.sflag [#allocation4], %s927_s22 }
 0x1e8   : > { %p1197_p4 = pnand %p1202_p2, %p1665_p3 }
 0x1ea   : > { %1416 = dma.done.wait (!%p1197_p4), %s928_s23, 384  }
 0x1eb   : > { %1418 = vsyncadd (!%p1197_p4), %s928_s23, 4294966912  ;;  %p13_p7 = scmp.ge.s32.totalorder %s1483_s15, 4   ;;  %s1666_s9 = smov %s1425_s10 }
 0x1ec   : > { %s1667_s10 = smov %s1429_s11  ;;  %s1668_s11 = smov %s1494_s18 }
 0x1ed   : > { %s1669_s12 = smov %s1483_s15  ;;  %15 = sbr.rel (!%p13_p7) target bundleno = 4 (0x4), region = 70 }
 0x1f4   :  { %933 = vsyncpa [#allocation3], 1 }
 0x1f5   :  { %935 = vsyncpa [#allocation3 + $0x1], 1 }
 0x1f6   :  { %936 = vsyncpa [#allocation4], 1 }
 0x1f7   :  { %938 = vsyncpa [#allocation4 + $0x1], 1 }

</bundles_post_ra>
